<compile_context>
chip_gen: v6e
topology: v6e:2x2x1
jax: 0.10.0
libtpu: 0.0.40
codegen_flags: <defaults>
</compile_context>

<pallas_src>
import jax
import jax.numpy as jnp
from jax.experimental import pallas as pl
from jax.experimental.pallas import tpu as pltpu

_SUBLANE = 8         # f32 sublane tile
_MAX_TILE_B = 4096   # default cap on rows per grid step


def _round_up(n, m):
    return ((n + m - 1) // m) * m


def _layernorm(x, gamma, beta, eps=1e-5):
    # PyTorch nn.LayerNorm over the last dim (biased variance, eps inside rsqrt).
    mu = jnp.mean(x, axis=-1, keepdims=True)
    xc = x - mu                                   # centered once, reused twice
    var = jnp.mean(xc * xc, axis=-1, keepdims=True)
    return xc * jax.lax.rsqrt(var + eps) * gamma + beta


def imitation_kernel(x_ref,
                     w1_ref, b1_ref, g0_ref, be0_ref,
                     w2_ref, b2_ref, g1_ref, be1_ref,
                     w3_ref, b3_ref, g2_ref, be2_ref,
                     w4_ref, b4_ref,
                     o_ref):
    cdt = w1_ref.dtype   # compute dtype for the MXU inputs (f32 or bf16)

    x = x_ref[...]
    h = jnp.dot(x, w1_ref[...], preferred_element_type=jnp.float32) + b1_ref[...]
    h = jnp.maximum(_layernorm(h, g0_ref[...], be0_ref[...]), 0.0)

    h = jnp.dot(h.astype(cdt), w2_ref[...],
                preferred_element_type=jnp.float32) + b2_ref[...]
    h = jnp.maximum(_layernorm(h, g1_ref[...], be1_ref[...]), 0.0)

    h = jnp.dot(h.astype(cdt), w3_ref[...],
                preferred_element_type=jnp.float32) + b3_ref[...]
    h = jnp.maximum(_layernorm(h, g2_ref[...], be2_ref[...]), 0.0)

    # Final projection straight to action_dim; the store is the exact
    # (tile_b, action_dim) slab -- no lane padding, no post-kernel slice copy.
    h = jnp.dot(h.astype(cdt), w4_ref[...],
                preferred_element_type=jnp.float32) + b4_ref[...]
    o_ref[...] = jnp.tanh(h).astype(o_ref.dtype)


def imitation_forward(x, params, *, max_tile_b=_MAX_TILE_B, min_tiles=1,
                      compute_dtype=jnp.float32):
    """x: (B, obs_dim) float32. params: dict of weights (see init_params).

    min_tiles: set to 2 on v7x (two TensorCores per chip) so large batches
    shard across both cores; leave at 1 on single-TC v5e/v6e.
    """
    B, obs_dim = x.shape
    action_dim = params["w4"].shape[1]

    # ---- batch tiling: as few, as large tiles as possible ----
    b_pad8 = _round_up(max(B, _SUBLANE), _SUBLANE)
    n_tiles = max(int(min_tiles), pl.cdiv(b_pad8, max_tile_b))
    tile_b = _round_up(pl.cdiv(b_pad8, n_tiles), _SUBLANE)
    b_pad = tile_b * n_tiles
    if b_pad != B:
        x = jnp.pad(x, ((0, b_pad - B), (0, 0)))
    grid = (n_tiles,)

    # Optional reduced-precision MXU inputs (accumulation stays f32 in-kernel;
    # LN / bias math stays f32 since those params are passed as f32).
    x = x.astype(compute_dtype)
    w1 = params["w1"].astype(compute_dtype)
    w2 = params["w2"].astype(compute_dtype)
    w3 = params["w3"].astype(compute_dtype)
    w4 = params["w4"].astype(compute_dtype)

    # Parameter tensors are tiny (<20 KiB total) -> give every grid step the
    # full parameter block (constant index_map => no re-DMA across steps);
    # only the batch axis of x / out is tiled.
    def full_spec(shape):
        return pl.BlockSpec(shape, lambda i, _n=len(shape): (0,) * _n)

    in_specs = [
        pl.BlockSpec((tile_b, obs_dim), lambda i: (i, 0)),        # x
        full_spec(w1.shape), full_spec(params["b1"].shape),
        full_spec(params["g0"].shape), full_spec(params["be0"].shape),
        full_spec(w2.shape), full_spec(params["b2"].shape),
        full_spec(params["g1"].shape), full_spec(params["be1"].shape),
        full_spec(w3.shape), full_spec(params["b3"].shape),
        full_spec(params["g2"].shape), full_spec(params["be2"].shape),
        full_spec(w4.shape), full_spec(params["b4"].shape),
    ]
    # block last dim == full array dim (action_dim), so no (8,128) constraint.
    out_spec = pl.BlockSpec((tile_b, action_dim), lambda i: (i, 0))

    out_padded = pl.pallas_call(
        imitation_kernel,
        out_shape=jax.ShapeDtypeStruct((b_pad, action_dim), jnp.float32),
        grid=grid,
        in_specs=in_specs,
        out_specs=out_spec,
        compiler_params=pltpu.CompilerParams(
            dimension_semantics=("parallel",)),   # shards across TCs when grid >= 2
    )(x,
      w1, params["b1"], params["g0"], params["be0"],
      w2, params["b2"], params["g1"], params["be1"],
      w3, params["b3"], params["g2"], params["be2"],
      w4, params["b4"])

    # Only batch padding (if any) to drop; near no-op.
    return out_padded[:B]


def init_params(key, observation_dim, action_dim, hidden_dim):
    """Deterministic init matching nn.Linear defaults (U(-k, k), k=1/sqrt(fan_in))
    and nn.LayerNorm defaults (gamma=1, beta=0). Weights stored as (in, out)."""
    ks = jax.random.split(key, 8)

    def linear(kw, kb, fan_in, fan_out):
        k = 1.0 / jnp.sqrt(jnp.float32(fan_in))
        w = jax.random.uniform(kw, (fan_in, fan_out), jnp.float32, -k, k)
        b = jax.random.uniform(kb, (1, fan_out), jnp.float32, -k, k)
        return w, b

    w1, b1 = linear(ks[0], ks[1], observation_dim, hidden_dim)
    w2, b2 = linear(ks[2], ks[3], hidden_dim, hidden_dim)
    w3, b3 = linear(ks[4], ks[5], hidden_dim, hidden_dim)
    w4, b4 = linear(ks[6], ks[7], hidden_dim, action_dim)

    ones = jnp.ones((1, hidden_dim), jnp.float32)
    zeros = jnp.zeros((1, hidden_dim), jnp.float32)
    return dict(w1=w1, b1=b1, g0=ones, be0=zeros,
                w2=w2, b2=b2, g1=ones, be1=zeros,
                w3=w3, b3=b3, g2=ones, be2=zeros,
                w4=w4, b4=b4)


def reference_forward(x, p):
    """Plain-JAX reference of the PyTorch forward, for a correctness check."""
    def ln(h, g, b):
        mu = jnp.mean(h, -1, keepdims=True)
        var = jnp.mean((h - mu) ** 2, -1, keepdims=True)
        return (h - mu) / jnp.sqrt(var + 1e-5) * g + b

    h = jax.nn.relu(ln(x @ p["w1"] + p["b1"], p["g0"], p["be0"]))
    h = jax.nn.relu(ln(h @ p["w2"] + p["b2"], p["g1"], p["be1"]))
    h = jax.nn.relu(ln(h @ p["w3"] + p["b3"], p["g2"], p["be2"]))
    return jnp.tanh(h @ p["w4"] + p["b4"])


if __name__ == "__main__":
    observation_dim, action_dim, hidden_dim = 16, 8, 32
    batch = 12   # deliberately not a multiple of 8: exercises the padding path

    key = jax.random.PRNGKey(0)
    kx, kp = jax.random.split(key)
    x = jax.random.normal(kx, (batch, observation_dim), jnp.float32)
    params = init_params(kp, observation_dim, action_dim, hidden_dim)

    out = imitation_forward(x, params)
    out = jax.block_until_ready(out)

    ref = reference_forward(x, params)
    assert out.shape == (batch, action_dim)
    assert jnp.allclose(out, ref, atol=1e-5, rtol=1e-5), "mismatch vs reference"

    print("KERNEL_OK")
</pallas_src>

<mosaic_0001>
module attributes {stable_mosaic.version = 11 : i64} {
  func.func @imitation_kernel(%arg0: i32, %arg1: memref<16x16xf32, #tpu.memory_space<vmem>>, %arg2: memref<16x32xf32, #tpu.memory_space<vmem>>, %arg3: memref<1x32xf32, #tpu.memory_space<vmem>>, %arg4: memref<1x32xf32, #tpu.memory_space<vmem>>, %arg5: memref<1x32xf32, #tpu.memory_space<vmem>>, %arg6: memref<32x32xf32, #tpu.memory_space<vmem>>, %arg7: memref<1x32xf32, #tpu.memory_space<vmem>>, %arg8: memref<1x32xf32, #tpu.memory_space<vmem>>, %arg9: memref<1x32xf32, #tpu.memory_space<vmem>>, %arg10: memref<32x32xf32, #tpu.memory_space<vmem>>, %arg11: memref<1x32xf32, #tpu.memory_space<vmem>>, %arg12: memref<1x32xf32, #tpu.memory_space<vmem>>, %arg13: memref<1x32xf32, #tpu.memory_space<vmem>>, %arg14: memref<32x8xf32, #tpu.memory_space<vmem>>, %arg15: memref<1x8xf32, #tpu.memory_space<vmem>>, %arg16: memref<16x8xf32, #tpu.memory_space<vmem>>) attributes {dimension_semantics = [#tpu.dimension_semantics<parallel>], iteration_bounds = array<i64: 1>, scalar_prefetch = 0 : i64, scratch_operands = 0 : i64, tpu.core_type = #tpu.core_type<tc>, window_params = [{transform_indices = @transform_0, window_bounds = array<i64: 16, 16>}, {pipeline_mode = #tpu.pipeline_mode<synchronous>, transform_indices = @transform_1, window_bounds = array<i64: 16, 32>}, {pipeline_mode = #tpu.pipeline_mode<synchronous>, transform_indices = @transform_2, window_bounds = array<i64: 1, 32>}, {pipeline_mode = #tpu.pipeline_mode<synchronous>, transform_indices = @transform_3, window_bounds = array<i64: 1, 32>}, {pipeline_mode = #tpu.pipeline_mode<synchronous>, transform_indices = @transform_4, window_bounds = array<i64: 1, 32>}, {pipeline_mode = #tpu.pipeline_mode<synchronous>, transform_indices = @transform_5, window_bounds = array<i64: 32, 32>}, {pipeline_mode = #tpu.pipeline_mode<synchronous>, transform_indices = @transform_6, window_bounds = array<i64: 1, 32>}, {pipeline_mode = #tpu.pipeline_mode<synchronous>, transform_indices = @transform_7, window_bounds = array<i64: 1, 32>}, {pipeline_mode = #tpu.pipeline_mode<synchronous>, transform_indices = @transform_8, window_bounds = array<i64: 1, 32>}, {pipeline_mode = #tpu.pipeline_mode<synchronous>, transform_indices = @transform_9, window_bounds = array<i64: 32, 32>}, {pipeline_mode = #tpu.pipeline_mode<synchronous>, transform_indices = @transform_10, window_bounds = array<i64: 1, 32>}, {pipeline_mode = #tpu.pipeline_mode<synchronous>, transform_indices = @transform_11, window_bounds = array<i64: 1, 32>}, {pipeline_mode = #tpu.pipeline_mode<synchronous>, transform_indices = @transform_12, window_bounds = array<i64: 1, 32>}, {pipeline_mode = #tpu.pipeline_mode<synchronous>, transform_indices = @transform_13, window_bounds = array<i64: 32, 8>}, {pipeline_mode = #tpu.pipeline_mode<synchronous>, transform_indices = @transform_14, window_bounds = array<i64: 1, 8>}, {transform_indices = @transform_15, window_bounds = array<i64: 16, 8>}]} {
    %c0 = arith.constant 0 : index
    %c0_0 = arith.constant 0 : index
    %0 = vector.load %arg1[%c0, %c0_0] : memref<16x16xf32, #tpu.memory_space<vmem>>, vector<16x16xf32>
    %c0_1 = arith.constant 0 : index
    %c0_2 = arith.constant 0 : index
    %1 = vector.load %arg2[%c0_1, %c0_2] : memref<16x32xf32, #tpu.memory_space<vmem>>, vector<16x32xf32>
    %cst = arith.constant dense<0.000000e+00> : vector<16x32xf32>
    %2 = tpu.matmul %0, %1, %cst {dimension_numbers = #tpu.dot_dimension_numbers<[1], [0], [0], [1], [0, 0, 1, 1], [], []>} : vector<16x16xf32>, vector<16x32xf32>, vector<16x32xf32> -> vector<16x32xf32>
    %c0_3 = arith.constant 0 : index
    %c0_4 = arith.constant 0 : index
    %3 = vector.load %arg3[%c0_3, %c0_4] : memref<1x32xf32, #tpu.memory_space<vmem>>, vector<1x32xf32>
    %4 = vector.broadcast %3 : vector<1x32xf32> to vector<16x32xf32>
    %5 = arith.addf %2, %4 : vector<16x32xf32>
    %c0_5 = arith.constant 0 : index
    %c0_6 = arith.constant 0 : index
    %6 = vector.load %arg4[%c0_5, %c0_6] : memref<1x32xf32, #tpu.memory_space<vmem>>, vector<1x32xf32>
    %c0_7 = arith.constant 0 : index
    %c0_8 = arith.constant 0 : index
    %7 = vector.load %arg5[%c0_7, %c0_8] : memref<1x32xf32, #tpu.memory_space<vmem>>, vector<1x32xf32>
    %cst_9 = arith.constant dense<0.000000e+00> : vector<16xf32>
    %8 = vector.multi_reduction <add>, %5, %cst_9 [1] : vector<16x32xf32> to vector<16xf32>
    %9 = vector.shape_cast %8 : vector<16xf32> to vector<16x1xf32>
    %cst_10 = arith.constant 3.200000e+01 : f32
    %10 = vector.broadcast %cst_10 : f32 to vector<16x1xf32>
    %11 = arith.divf %9, %10 : vector<16x1xf32>
    %12 = vector.broadcast %11 : vector<16x1xf32> to vector<16x32xf32>
    %13 = arith.subf %5, %12 : vector<16x32xf32>
    %14 = arith.mulf %13, %13 : vector<16x32xf32>
    %cst_11 = arith.constant dense<0.000000e+00> : vector<16xf32>
    %15 = vector.multi_reduction <add>, %14, %cst_11 [1] : vector<16x32xf32> to vector<16xf32>
    %16 = vector.shape_cast %15 : vector<16xf32> to vector<16x1xf32>
    %cst_12 = arith.constant 3.200000e+01 : f32
    %17 = vector.broadcast %cst_12 : f32 to vector<16x1xf32>
    %18 = arith.divf %16, %17 : vector<16x1xf32>
    %cst_13 = arith.constant 9.99999974E-6 : f32
    %19 = vector.broadcast %cst_13 : f32 to vector<16x1xf32>
    %20 = arith.addf %18, %19 : vector<16x1xf32>
    %21 = math.rsqrt %20 : vector<16x1xf32>
    %22 = vector.broadcast %21 : vector<16x1xf32> to vector<16x32xf32>
    %23 = arith.mulf %13, %22 : vector<16x32xf32>
    %24 = vector.broadcast %6 : vector<1x32xf32> to vector<16x32xf32>
    %25 = arith.mulf %23, %24 : vector<16x32xf32>
    %26 = vector.broadcast %7 : vector<1x32xf32> to vector<16x32xf32>
    %27 = arith.addf %25, %26 : vector<16x32xf32>
    %cst_14 = arith.constant 0.000000e+00 : f32
    %28 = vector.broadcast %cst_14 : f32 to vector<16x32xf32>
    %29 = arith.maximumf %27, %28 : vector<16x32xf32>
    %c0_15 = arith.constant 0 : index
    %c0_16 = arith.constant 0 : index
    %30 = vector.load %arg6[%c0_15, %c0_16] : memref<32x32xf32, #tpu.memory_space<vmem>>, vector<32x32xf32>
    %cst_17 = arith.constant dense<0.000000e+00> : vector<16x32xf32>
    %31 = tpu.matmul %29, %30, %cst_17 {dimension_numbers = #tpu.dot_dimension_numbers<[1], [0], [0], [1], [0, 0, 1, 1], [], []>} : vector<16x32xf32>, vector<32x32xf32>, vector<16x32xf32> -> vector<16x32xf32>
    %c0_18 = arith.constant 0 : index
    %c0_19 = arith.constant 0 : index
    %32 = vector.load %arg7[%c0_18, %c0_19] : memref<1x32xf32, #tpu.memory_space<vmem>>, vector<1x32xf32>
    %33 = vector.broadcast %32 : vector<1x32xf32> to vector<16x32xf32>
    %34 = arith.addf %31, %33 : vector<16x32xf32>
    %c0_20 = arith.constant 0 : index
    %c0_21 = arith.constant 0 : index
    %35 = vector.load %arg8[%c0_20, %c0_21] : memref<1x32xf32, #tpu.memory_space<vmem>>, vector<1x32xf32>
    %c0_22 = arith.constant 0 : index
    %c0_23 = arith.constant 0 : index
    %36 = vector.load %arg9[%c0_22, %c0_23] : memref<1x32xf32, #tpu.memory_space<vmem>>, vector<1x32xf32>
    %cst_24 = arith.constant dense<0.000000e+00> : vector<16xf32>
    %37 = vector.multi_reduction <add>, %34, %cst_24 [1] : vector<16x32xf32> to vector<16xf32>
    %38 = vector.shape_cast %37 : vector<16xf32> to vector<16x1xf32>
    %cst_25 = arith.constant 3.200000e+01 : f32
    %39 = vector.broadcast %cst_25 : f32 to vector<16x1xf32>
    %40 = arith.divf %38, %39 : vector<16x1xf32>
    %41 = vector.broadcast %40 : vector<16x1xf32> to vector<16x32xf32>
    %42 = arith.subf %34, %41 : vector<16x32xf32>
    %43 = arith.mulf %42, %42 : vector<16x32xf32>
    %cst_26 = arith.constant dense<0.000000e+00> : vector<16xf32>
    %44 = vector.multi_reduction <add>, %43, %cst_26 [1] : vector<16x32xf32> to vector<16xf32>
    %45 = vector.shape_cast %44 : vector<16xf32> to vector<16x1xf32>
    %cst_27 = arith.constant 3.200000e+01 : f32
    %46 = vector.broadcast %cst_27 : f32 to vector<16x1xf32>
    %47 = arith.divf %45, %46 : vector<16x1xf32>
    %cst_28 = arith.constant 9.99999974E-6 : f32
    %48 = vector.broadcast %cst_28 : f32 to vector<16x1xf32>
    %49 = arith.addf %47, %48 : vector<16x1xf32>
    %50 = math.rsqrt %49 : vector<16x1xf32>
    %51 = vector.broadcast %50 : vector<16x1xf32> to vector<16x32xf32>
    %52 = arith.mulf %42, %51 : vector<16x32xf32>
    %53 = vector.broadcast %35 : vector<1x32xf32> to vector<16x32xf32>
    %54 = arith.mulf %52, %53 : vector<16x32xf32>
    %55 = vector.broadcast %36 : vector<1x32xf32> to vector<16x32xf32>
    %56 = arith.addf %54, %55 : vector<16x32xf32>
    %cst_29 = arith.constant 0.000000e+00 : f32
    %57 = vector.broadcast %cst_29 : f32 to vector<16x32xf32>
    %58 = arith.maximumf %56, %57 : vector<16x32xf32>
    %c0_30 = arith.constant 0 : index
    %c0_31 = arith.constant 0 : index
    %59 = vector.load %arg10[%c0_30, %c0_31] : memref<32x32xf32, #tpu.memory_space<vmem>>, vector<32x32xf32>
    %cst_32 = arith.constant dense<0.000000e+00> : vector<16x32xf32>
    %60 = tpu.matmul %58, %59, %cst_32 {dimension_numbers = #tpu.dot_dimension_numbers<[1], [0], [0], [1], [0, 0, 1, 1], [], []>} : vector<16x32xf32>, vector<32x32xf32>, vector<16x32xf32> -> vector<16x32xf32>
    %c0_33 = arith.constant 0 : index
    %c0_34 = arith.constant 0 : index
    %61 = vector.load %arg11[%c0_33, %c0_34] : memref<1x32xf32, #tpu.memory_space<vmem>>, vector<1x32xf32>
    %62 = vector.broadcast %61 : vector<1x32xf32> to vector<16x32xf32>
    %63 = arith.addf %60, %62 : vector<16x32xf32>
    %c0_35 = arith.constant 0 : index
    %c0_36 = arith.constant 0 : index
    %64 = vector.load %arg12[%c0_35, %c0_36] : memref<1x32xf32, #tpu.memory_space<vmem>>, vector<1x32xf32>
    %c0_37 = arith.constant 0 : index
    %c0_38 = arith.constant 0 : index
    %65 = vector.load %arg13[%c0_37, %c0_38] : memref<1x32xf32, #tpu.memory_space<vmem>>, vector<1x32xf32>
    %cst_39 = arith.constant dense<0.000000e+00> : vector<16xf32>
    %66 = vector.multi_reduction <add>, %63, %cst_39 [1] : vector<16x32xf32> to vector<16xf32>
    %67 = vector.shape_cast %66 : vector<16xf32> to vector<16x1xf32>
    %cst_40 = arith.constant 3.200000e+01 : f32
    %68 = vector.broadcast %cst_40 : f32 to vector<16x1xf32>
    %69 = arith.divf %67, %68 : vector<16x1xf32>
    %70 = vector.broadcast %69 : vector<16x1xf32> to vector<16x32xf32>
    %71 = arith.subf %63, %70 : vector<16x32xf32>
    %72 = arith.mulf %71, %71 : vector<16x32xf32>
    %cst_41 = arith.constant dense<0.000000e+00> : vector<16xf32>
    %73 = vector.multi_reduction <add>, %72, %cst_41 [1] : vector<16x32xf32> to vector<16xf32>
    %74 = vector.shape_cast %73 : vector<16xf32> to vector<16x1xf32>
    %cst_42 = arith.constant 3.200000e+01 : f32
    %75 = vector.broadcast %cst_42 : f32 to vector<16x1xf32>
    %76 = arith.divf %74, %75 : vector<16x1xf32>
    %cst_43 = arith.constant 9.99999974E-6 : f32
    %77 = vector.broadcast %cst_43 : f32 to vector<16x1xf32>
    %78 = arith.addf %76, %77 : vector<16x1xf32>
    %79 = math.rsqrt %78 : vector<16x1xf32>
    %80 = vector.broadcast %79 : vector<16x1xf32> to vector<16x32xf32>
    %81 = arith.mulf %71, %80 : vector<16x32xf32>
    %82 = vector.broadcast %64 : vector<1x32xf32> to vector<16x32xf32>
    %83 = arith.mulf %81, %82 : vector<16x32xf32>
    %84 = vector.broadcast %65 : vector<1x32xf32> to vector<16x32xf32>
    %85 = arith.addf %83, %84 : vector<16x32xf32>
    %cst_44 = arith.constant 0.000000e+00 : f32
    %86 = vector.broadcast %cst_44 : f32 to vector<16x32xf32>
    %87 = arith.maximumf %85, %86 : vector<16x32xf32>
    %c0_45 = arith.constant 0 : index
    %c0_46 = arith.constant 0 : index
    %88 = vector.load %arg14[%c0_45, %c0_46] : memref<32x8xf32, #tpu.memory_space<vmem>>, vector<32x8xf32>
    %cst_47 = arith.constant dense<0.000000e+00> : vector<16x8xf32>
    %89 = tpu.matmul %87, %88, %cst_47 {dimension_numbers = #tpu.dot_dimension_numbers<[1], [0], [0], [1], [0, 0, 1, 1], [], []>} : vector<16x32xf32>, vector<32x8xf32>, vector<16x8xf32> -> vector<16x8xf32>
    %c0_48 = arith.constant 0 : index
    %c0_49 = arith.constant 0 : index
    %90 = vector.load %arg15[%c0_48, %c0_49] : memref<1x8xf32, #tpu.memory_space<vmem>>, vector<1x8xf32>
    %91 = vector.broadcast %90 : vector<1x8xf32> to vector<16x8xf32>
    %92 = arith.addf %89, %91 : vector<16x8xf32>
    %93 = math.tanh %92 : vector<16x8xf32>
    %c0_50 = arith.constant 0 : index
    %c0_51 = arith.constant 0 : index
    %94 = vector.load %arg16[%c0_50, %c0_51] : memref<16x8xf32, #tpu.memory_space<vmem>>, vector<16x8xf32>
    tpu.vector_store %arg16[%c0_50, %c0_51], %93 {strides = array<i32>} : memref<16x8xf32, #tpu.memory_space<vmem>>, vector<16x8xf32>,
    return
  }
  func.func @transform_0(%arg0: i32) -> (i32, i32) {
    %c0_i32 = arith.constant 0 : i32
    %c0_i32_0 = arith.constant 0 : i32
    return %arg0, %c0_i32 : i32, i32
  }
  func.func @transform_1(%arg0: i32) -> (i32, i32) {
    %c0_i32 = arith.constant 0 : i32
    %c0_i32_0 = arith.constant 0 : i32
    %c0_i32_1 = arith.constant 0 : i32
    return %c0_i32, %c0_i32_0 : i32, i32
  }
  func.func @transform_2(%arg0: i32) -> (i32, i32) {
    %c0_i32 = arith.constant 0 : i32
    %c0_i32_0 = arith.constant 0 : i32
    %c0_i32_1 = arith.constant 0 : i32
    return %c0_i32, %c0_i32_0 : i32, i32
  }
  func.func @transform_3(%arg0: i32) -> (i32, i32) {
    %c0_i32 = arith.constant 0 : i32
    %c0_i32_0 = arith.constant 0 : i32
    %c0_i32_1 = arith.constant 0 : i32
    return %c0_i32, %c0_i32_0 : i32, i32
  }
  func.func @transform_4(%arg0: i32) -> (i32, i32) {
    %c0_i32 = arith.constant 0 : i32
    %c0_i32_0 = arith.constant 0 : i32
    %c0_i32_1 = arith.constant 0 : i32
    return %c0_i32, %c0_i32_0 : i32, i32
  }
  func.func @transform_5(%arg0: i32) -> (i32, i32) {
    %c0_i32 = arith.constant 0 : i32
    %c0_i32_0 = arith.constant 0 : i32
    %c0_i32_1 = arith.constant 0 : i32
    return %c0_i32, %c0_i32_0 : i32, i32
  }
  func.func @transform_6(%arg0: i32) -> (i32, i32) {
    %c0_i32 = arith.constant 0 : i32
    %c0_i32_0 = arith.constant 0 : i32
    %c0_i32_1 = arith.constant 0 : i32
    return %c0_i32, %c0_i32_0 : i32, i32
  }
  func.func @transform_7(%arg0: i32) -> (i32, i32) {
    %c0_i32 = arith.constant 0 : i32
    %c0_i32_0 = arith.constant 0 : i32
    %c0_i32_1 = arith.constant 0 : i32
    return %c0_i32, %c0_i32_0 : i32, i32
  }
  func.func @transform_8(%arg0: i32) -> (i32, i32) {
    %c0_i32 = arith.constant 0 : i32
    %c0_i32_0 = arith.constant 0 : i32
    %c0_i32_1 = arith.constant 0 : i32
    return %c0_i32, %c0_i32_0 : i32, i32
  }
  func.func @transform_9(%arg0: i32) -> (i32, i32) {
    %c0_i32 = arith.constant 0 : i32
    %c0_i32_0 = arith.constant 0 : i32
    %c0_i32_1 = arith.constant 0 : i32
    return %c0_i32, %c0_i32_0 : i32, i32
  }
  func.func @transform_10(%arg0: i32) -> (i32, i32) {
    %c0_i32 = arith.constant 0 : i32
    %c0_i32_0 = arith.constant 0 : i32
    %c0_i32_1 = arith.constant 0 : i32
    return %c0_i32, %c0_i32_0 : i32, i32
  }
  func.func @transform_11(%arg0: i32) -> (i32, i32) {
    %c0_i32 = arith.constant 0 : i32
    %c0_i32_0 = arith.constant 0 : i32
    %c0_i32_1 = arith.constant 0 : i32
    return %c0_i32, %c0_i32_0 : i32, i32
  }
  func.func @transform_12(%arg0: i32) -> (i32, i32) {
    %c0_i32 = arith.constant 0 : i32
    %c0_i32_0 = arith.constant 0 : i32
    %c0_i32_1 = arith.constant 0 : i32
    return %c0_i32, %c0_i32_0 : i32, i32
  }
  func.func @transform_13(%arg0: i32) -> (i32, i32) {
    %c0_i32 = arith.constant 0 : i32
    %c0_i32_0 = arith.constant 0 : i32
    %c0_i32_1 = arith.constant 0 : i32
    return %c0_i32, %c0_i32_0 : i32, i32
  }
  func.func @transform_14(%arg0: i32) -> (i32, i32) {
    %c0_i32 = arith.constant 0 : i32
    %c0_i32_0 = arith.constant 0 : i32
    %c0_i32_1 = arith.constant 0 : i32
    return %c0_i32, %c0_i32_0 : i32, i32
  }
  func.func @transform_15(%arg0: i32) -> (i32, i32) {
    %c0_i32 = arith.constant 0 : i32
    %c0_i32_0 = arith.constant 0 : i32
    return %arg0, %c0_i32 : i32, i32
  }
}

</mosaic_0001>

<bundles_post_ra>
// kernel: tpu_custom_call.1
= control target key start
LH: loop header
LB: loop body
LE: loop exit
PB: predicated region body
PF: predicated region fallthrough
CT: control target
= control target key end

     0   :  { %20 = vsyncpa [#allocation3], 0  ;;  %s1132_s0 = inlined_call_operand.vmem [shape: f32[16,16], index: 0, kind: input, shape index: {}]   ;;  %s1133_s1 = inlined_call_operand.hbm [shape: f32[16,32], index: 1, kind: input, shape index: {}]   ;;  %s1134_s2 = inlined_call_operand.hbm [shape: f32[1,32], index: 2, kind: input, shape index: {}]   ;;  %s1135_s3 = inlined_call_operand.hbm [shape: f32[1,32], index: 3, kind: input, shape index: {}]   ;;  %s1136_s4 = inlined_call_operand.hbm [shape: f32[1,32], index: 4, kind: input, shape index: {}]   ;;  %s1137_s5 = inlined_call_operand.vmem [shape: f32[32,32], index: 5, kind: input, shape index: {}]   ;;  %s1138_s6 = inlined_call_operand.hbm [shape: f32[1,32], index: 6, kind: input, shape index: {}]   ;;  %s1139_s7 = inlined_call_operand.hbm [shape: f32[1,32], index: 7, kind: input, shape index: {}]   ;;  %s1140_s8 = inlined_call_operand.hbm [shape: f32[1,32], index: 8, kind: input, shape index: {}]   ;;  %s1141_s9 = inlined_call_operand.hbm [shape: f32[32,32], index: 9, kind: input, shape index: {}]   ;;  %s1142_s10 = inlined_call_operand.vmem [shape: f32[1,32], index: 10, kind: input, shape index: {}]   ;;  %s1143_s11 = inlined_call_operand.vmem [shape: f32[1,32], index: 11, kind: input, shape index: {}]   ;;  %s1144_s12 = inlined_call_operand.vmem [shape: f32[1,32], index: 12, kind: input, shape index: {}]   ;;  %s1145_s13 = inlined_call_operand.vmem [shape: f32[32,8], index: 13, kind: input, shape index: {}]   ;;  %s1146_s14 = inlined_call_operand.vmem [shape: f32[1,8], index: 14, kind: input, shape index: {}]   ;;  %s1147_s15 = inlined_call_operand.vmem [shape: f32[16,8], index: 15, kind: output, shape index: {}]  }
   0x1   :  { %21 = vsyncpa [#allocation5], 0 }
   0x2   :  { %22 = vsyncpa [#allocation8], 0 }
   0x3   :  { %23 = vsyncpa [#allocation11], 0 }
   0x4   :  { %24 = vsyncpa [#allocation14], 0  ;;  %s946_s18 = smov [#allocation4]   ;;  %s947_s20 = smov [#allocation7]  }
   0x5   :  { %s45_s19 = sshll.u32 %s946_s18, 4  ;;  %s65_s21 = sshll.u32 %s947_s20, 4  ;;  %s46_s19 = int_to_ptr.vmem [resolvable:$true] %s45_s19  ;;  %s66_s21 = int_to_ptr.vmem [resolvable:$true] %s65_s21 }
   0x6   :  { %s784_s22 = scalar_lea.vmem %s46_s19, 16  ;;  %s788_s23 = scalar_lea.vmem %s46_s19, 32 }
   0x7   :  { %p785_p0 = scmp.ne.s32.totalorder %s46_s19, %s784_s22  ;;  %p789_p1 = scmp.lt.s32.totalorder %s46_s19, %s46_s19 }
   0x8   :  { %p790_p2 = scmp.lt.s32.totalorder %s788_s23, %s784_s22 }
   0xa   :  { %p791_p3 = por %p790_p2, %p789_p1 }
   0xc   :  { %p792_p4 = pnand %p791_p3, %p785_p0 }
   0xe   :  { %795 = shalt.err (!%p792_p4)
}
   0xf   :  { %48 = dma.hbm_to_vmem [thread:$0]  %s1134_s2, 16, %s46_s19, [#allocation5]  }
  0x10   :  { %s804_s26 = scalar_lea.vmem %s66_s21, 16  ;;  %s808_s27 = scalar_lea.vmem %s66_s21, 32 }
  0x11   :  { %p805_p5 = scmp.ne.s32.totalorder %s66_s21, %s804_s26  ;;  %p809_p6 = scmp.lt.s32.totalorder %s66_s21, %s66_s21 }
  0x12   :  { %p810_p7 = scmp.lt.s32.totalorder %s808_s27, %s804_s26 }
  0x14   :  { %p811_p8 = por %p810_p7, %p809_p6 }
  0x16   :  { %p812_p9 = pnand %p811_p8, %p805_p5 }
  0x18   :  { %815 = shalt.err (!%p812_p9)
}
  0x19   :  { %68 = dma.hbm_to_vmem [thread:$0]  %s1136_s4, 16, %s66_s21, [#allocation8]  }
  0x1a   :  { %s948_s30 = smov [#allocation10]   ;;  %s949_s17 = smov [#allocation2]  }
  0x1b   :  { %s87_s16 = sshll.u32 %s948_s30, 4  ;;  %s32_s18 = sshll.u32 %s949_s17, 4  ;;  %s88_s16 = int_to_ptr.vmem [resolvable:$true] %s87_s16  ;;  %s33_s18 = int_to_ptr.vmem [resolvable:$true] %s32_s18 }
  0x1c   :  { %s824_s20 = scalar_lea.vmem %s88_s16, 16  ;;  %s828_s2 = scalar_lea.vmem %s88_s16, 32 }
  0x1d   :  { %p825_p10 = scmp.ne.s32.totalorder %s88_s16, %s824_s20  ;;  %p829_p11 = scmp.lt.s32.totalorder %s88_s16, %s88_s16 }
  0x1e   :  { %p830_p12 = scmp.lt.s32.totalorder %s828_s2, %s824_s20 }
  0x20   :  { %p831_p13 = por %p830_p12, %p829_p11 }
  0x22   :  { %p832_p0 = pnand %p831_p13, %p825_p10 }
  0x24   :  { %835 = shalt.err (!%p832_p0)
}
  0x25   :  { %90 = dma.hbm_to_vmem [thread:$0]  %s1139_s7, 16, %s88_s16, [#allocation11]  }
  0x26   :  { %s844_s23 = scalar_lea.vmem %s33_s18, 256  ;;  %p849_p2 = scmp.lt.s32.totalorder %s33_s18, %s33_s18 }
  0x27   :  { %p845_p1 = scmp.ne.s32.totalorder %s33_s18, %s844_s23  ;;  %p850_p3 = scmp.lt.s32.totalorder %s844_s23, %s844_s23 }
  0x29   :  { %p851_p4 = por %p850_p3, %p849_p2 }
  0x2b   :  { %p852_p5 = pnand %p851_p4, %p845_p1 }
  0x2d   :  { %855 = shalt.err (!%p852_p5)
}
  0x2e   :  { %s950_s4 = smov 128   ;;  %s951_s21 = smov 8  }
  0x2f   :  { %38 = dma.hbm_to_vmem [thread:$0]  %s1133_s1, 256, %s33_s18, [#allocation3], %s950_s4, %s950_s4, %s951_s21  }
  0x30   :  { %s952_s26 = smov [#allocation6]   ;;  %s953_s28 = smov [#allocation9]  }
  0x31   :  { %s55_s27 = sshll.u32 %s952_s26, 4  ;;  %s77_s7 = sshll.u32 %s953_s28, 4  ;;  %s56_s27 = int_to_ptr.vmem [resolvable:$true] %s55_s27  ;;  %s78_s7 = int_to_ptr.vmem [resolvable:$true] %s77_s7 }
  0x32   :  { %s864_s29 = scalar_lea.vmem %s56_s27, 16  ;;  %s868_s30 = scalar_lea.vmem %s56_s27, 32 }
  0x33   :  { %p865_p6 = scmp.ne.s32.totalorder %s56_s27, %s864_s29  ;;  %p869_p7 = scmp.lt.s32.totalorder %s56_s27, %s56_s27 }
  0x34   :  { %p870_p8 = scmp.lt.s32.totalorder %s868_s30, %s864_s29 }
  0x36   :  { %p871_p9 = por %p870_p8, %p869_p7 }
  0x38   :  { %p872_p10 = pnand %p871_p9, %p865_p6 }
  0x3a   :  { %875 = shalt.err (!%p872_p10)
}
  0x3b   :  { %58 = dma.hbm_to_vmem [thread:$0]  %s1135_s3, 16, %s56_s27, [#allocation5]  }
  0x3c   :  { %s884_s20 = scalar_lea.vmem %s78_s7, 16  ;;  %s888_s1 = scalar_lea.vmem %s78_s7, 32 }
  0x3d   :  { %p885_p11 = scmp.ne.s32.totalorder %s78_s7, %s884_s20  ;;  %p889_p12 = scmp.lt.s32.totalorder %s78_s7, %s78_s7 }
  0x3e   :  { %p890_p13 = scmp.lt.s32.totalorder %s888_s1, %s884_s20 }
  0x40   :  { %p891_p0 = por %p890_p13, %p889_p12 }
  0x42   :  { %p892_p1 = pnand %p891_p0, %p885_p11 }
  0x44   :  { %895 = shalt.err (!%p892_p1)
}
  0x45   :  { %80 = dma.hbm_to_vmem [thread:$0]  %s1138_s6, 16, %s78_s7, [#allocation8]  }
  0x46   :  { %s954_s19 = smov [#allocation12]   ;;  %s955_s23 = smov [#allocation13]  }
  0x47   :  { %s97_s22 = sshll.u32 %s954_s19, 4  ;;  %s106_s24 = sshll.u32 %s955_s23, 4  ;;  %s98_s22 = int_to_ptr.vmem [resolvable:$true] %s97_s22  ;;  %s107_s24 = int_to_ptr.vmem [resolvable:$true] %s106_s24 }
  0x48   :  { %s904_s25 = scalar_lea.vmem %s98_s22, 16  ;;  %s908_s3 = scalar_lea.vmem %s98_s22, 32 }
  0x49   :  { %p905_p2 = scmp.ne.s32.totalorder %s98_s22, %s904_s25  ;;  %p909_p3 = scmp.lt.s32.totalorder %s98_s22, %s98_s22 }
  0x4a   :  { %p910_p4 = scmp.lt.s32.totalorder %s908_s3, %s904_s25 }
  0x4c   :  { %p911_p5 = por %p910_p4, %p909_p3 }
  0x4e   :  { %p912_p6 = pnand %p911_p5, %p905_p2 }
  0x50   :  { %915 = shalt.err (!%p912_p6)
}
  0x51   :  { %100 = dma.hbm_to_vmem [thread:$0]  %s1140_s8, 16, %s98_s22, [#allocation11]  }
  0x52   :  { %s924_s28 = scalar_lea.vmem %s107_s24, 512  ;;  %p929_p8 = scmp.lt.s32.totalorder %s107_s24, %s107_s24 }
  0x53   :  { %p925_p7 = scmp.ne.s32.totalorder %s107_s24, %s924_s28  ;;  %p930_p9 = scmp.lt.s32.totalorder %s924_s28, %s924_s28 }
  0x55   :  { %p931_p10 = por %p930_p9, %p929_p8 }
  0x57   :  { %p932_p11 = pnand %p931_p10, %p925_p7 }
  0x59   :  { %935 = shalt.err (!%p932_p11)
}
  0x5a   :  { %112 = dma.hbm_to_vmem [thread:$0]  %s1141_s9, 512, %s107_s24, [#allocation14], %s950_s4, %s950_s4, %s951_s21  }
  0x5b   :  { %936 = dma.done.wait [#allocation3], 256  }
  0x5c   :  { %937 = vsyncadd [#allocation3], 4294967040 }
  0x5d   :  { %938 = dma.done.wait [#allocation5], 32  }
  0x5e   :  { %939 = vsyncadd [#allocation5], 4294967264 }
  0x5f   :  { %940 = dma.done.wait [#allocation8], 32  }
  0x60   :  { %941 = vsyncadd [#allocation8], 4294967264 }
  0x61   :  { %942 = dma.done.wait [#allocation11], 32  }
  0x62   :  { %943 = vsyncadd [#allocation11], 4294967264 }
  0x63   :  { %944 = dma.done.wait [#allocation14], 512  }
  0x64   :  { %945 = vsyncadd [#allocation14], 4294966784  ;;  %vm158_vm0 = vcmask 130048   ;;  %v150_v0 = vld [vmem:[#allocation2 + $0x8] sm:$0xff]  ;;  %v149_v1 = vld [vmem:[#allocation2] sm:$0xff]  ;;  %vm242_vm1 = vcmask 261120  }
  0x65   :  { %v147_v2 = vld [vmem:[%s1132_s0] sm:$0xff]  ;;  %710 = vmatprep.subr.mxu0 %v150_v0  ;;  %v148_v3 = vld [vmem:[%s1132_s0 + $0x8] sm:$0xff]  ;;  %v670_v5 = vld [vmem:[#allocation4] ss:$0 sm:$0xff]  ;;  %vm658_vm2 = vcmask 64512  }
  0x66   :  { %714 = vmatprep.mubr.msk.f32.mxu0 %vm158_vm0, %v147_v2  ;;  %711 = vmatpush3.msra.mxu0 %v150_v0  ;;  %v291_v21 = vld [vmem:[%s1137_s5 + $0x18] sm:$0xff]  ;;  %v290_v22 = vld [vmem:[%s1137_s5 + $0x10] sm:$0xff]  ;;  %v289_v23 = vld [vmem:[%s1137_s5 + $0x8] sm:$0xff] }
  0x67   :  { %712 = vmatprep.subr.mxu0 %v149_v1  ;;  %717 = vmatprep.subr.mxu1 %v291_v21  ;;  %v288_v24 = vld [vmem:[%s1137_s5] sm:$0xff]  ;;  %v673_v32 = vld [vmem:[#allocation6] ss:$0 sm:$0xff]  ;;  %v674_v34 = vld [vmem:[#allocation7] ss:$0 sm:$0xff] }
  0x68   :  { %713 = vmatpush3.msra.mxu0 %v149_v1  ;;  %718 = vmatpush3.msra.mxu1 %v291_v21  ;;  %v675_v43 = vld [vmem:[#allocation9] ss:$0 sm:$0xff]  ;;  %v428_v61 = vld [vmem:[#allocation13 + $0x10] sm:$0xff]  ;;  %v427_v62 = vld [vmem:[#allocation13 + $0x8] sm:$0xff] }
  0x69   :  { %715 = vmatmul.mubr.msk.f32.vlgmr.msra.gmra.mxu0 %vm158_vm0, %v148_v3  ;;  %719 = vmatprep.subr.mxu1 %v290_v22  ;;  %v429_v60 = vld [vmem:[#allocation13 + $0x18] sm:$0xff]  ;;  %v426_v63 = vld [vmem:[#allocation13] sm:$0xff] }
  0x6a   :  { %720 = vmatpush3.msra.mxu1 %v290_v22  ;;  %728 = vmatprep.subr.mxu0 %v429_v60 }
  0x6b   :  { %721 = vmatprep.subr.mxu1 %v289_v23  ;;  %729 = vmatpush3.msra.mxu0 %v429_v60 }
  0x6c   :  { %722 = vmatpush3.msra.mxu1 %v289_v23  ;;  %730 = vmatprep.subr.mxu0 %v428_v61 }
  0x6d   :  { %723 = vmatprep.subr.mxu1 %v288_v24  ;;  %731 = vmatpush3.msra.mxu0 %v428_v61 }
  0x6e   :  { %724 = vmatpush3.msra.mxu1 %v288_v24  ;;  %732 = vmatprep.subr.mxu0 %v427_v62 }
  0x6f   :  { %733 = vmatpush3.msra.mxu0 %v427_v62 }
  0x70   :  { %734 = vmatprep.subr.mxu0 %v426_v63 }
  0x71   :  { %735 = vmatpush3.msra.mxu0 %v426_v63 }
 0x129   :  { %v716_v4 = vpop.f32.mrf.mxu0 }
 0x12a   :  { %v237_v8 = vadd.f32 %v716_v4, %v670_v5 }
 0x12b   :  { %v231_v6 = vpop.f32.mrf.mxu0 }
 0x12c   :  { %v232_v7 = vadd.f32 %v670_v5, %v231_v6  ;;  %v246_v10 = vsel %vm242_vm1, %v237_v8, 0.0 }
 0x12e   :  { %v243_v9 = vsel %vm242_vm1, %v232_v7, 0.0 }
 0x12f   :  { %244 = vadd.xlane.f32.xlu0 %v243_v9 }
 0x133   :  { %247 = vadd.xlane.f32.xlu0 %v246_v10  ;;  %v679_v10 = vld [vmem:[#allocation12] ss:$0 sm:$0xff] }
 0x1b8   :  { %v245_v11 = vpop.xlane.xlu0 %244 }
 0x1b9   :  { %v250_v12 = vmul.f32 0.03125, %v245_v11 }
 0x1bb   :  { %v252_v13 = vsub.f32 %v232_v7, %v250_v12  ;;  %v678_v7 = vld [vmem:[#allocation10] ss:$0 sm:$0xff] }
 0x1bc   :  { %v248_v14 = vpop.xlane.xlu0 %247 }
 0x1bd   :  { %v251_v15 = vmul.f32 0.03125, %v248_v14  ;;  %v254_v16 = vmul.f32 %v252_v13, %v252_v13 }
 0x1bf   :  { %v253_v17 = vsub.f32 %v237_v8, %v251_v15  ;;  %v256_v18 = vsel %vm242_vm1, %v254_v16, 0.0 }
 0x1c0   :  { %257 = vadd.xlane.f32.xlu1 %v256_v18  ;;  %v680_v18 = vld [vmem:[%s1142_s10] ss:$0 sm:$0xff] }
 0x1c1   :  { %v255_v19 = vmul.f32 %v253_v17, %v253_v17 }
 0x1c3   :  { %v259_v20 = vsel %vm242_vm1, %v255_v19, 0.0 }
 0x1c4   :  { %260 = vadd.xlane.f32.xlu1 %v259_v20 }
 0x249   :  { %v258_v25 = vpop.xlane.xlu1 %257 }
 0x24a   :  { %v262_v26 = vmul.f32 0.03125, %v258_v25 }
 0x24c   :  { %v264_v27 = vadd.f32 1e-05, %v262_v26 }
 0x24d   :  { %v261_v28 = vpop.xlane.xlu1 %260 }
 0x24e   :  { %760 = vrsqrt.f32 %v264_v27  ;;  %v263_v29 = vmul.f32 0.03125, %v261_v28 }
 0x250   :  { %v265_v30 = vadd.f32 1e-05, %v263_v29 }
 0x252   :  { %762 = vrsqrt.f32 %v265_v30 }
 0x25b   :  { %v761_v31 = vpop.eup %760 }
 0x25c   :  { %v268_v33 = vmul.f32 %v761_v31, %v252_v13 }
 0x25e   :  { %v276_v35 = vmul.f32 %v673_v32, %v268_v33 }
 0x25f   :  { %v763_v36 = vpop.eup %762 }
 0x260   :  { %v269_v37 = vmul.f32 %v763_v36, %v253_v17  ;;  %v284_v38 = vadd.f32 %v674_v34, %v276_v35  ;;  %v567_v35 = vld [vmem:[%s1145_s13 + $0x18] sm:$0xff]  ;;  %v566_v36 = vld [vmem:[%s1145_s13 + $0x10] sm:$0xff] }
 0x261   :  { %739 = vmatprep.subr.mxu1 %v567_v35 }
 0x262   :  { %v277_v39 = vmul.f32 %v673_v32, %v269_v37  ;;  %v286_v40 = vmax.f32 %v284_v38, 0.0  ;;  %v565_v37 = vld [vmem:[%s1145_s13 + $0x8] sm:$0xff]  ;;  %v564_v38 = vld [vmem:[%s1145_s13] sm:$0xff] }
 0x264   :  { %v285_v41 = vadd.f32 %v674_v34, %v277_v39  ;;  %725 = vmatprep.mubr.msk.f32.mxu1 %vm242_vm1, %v286_v40 }
 0x266   :  { %v287_v42 = vmax.f32 %v285_v41, 0.0 }
 0x268   :  { %726 = vmatmul.mubr.msk.f32.vlgmr.msra.gmra.mxu1 %vm242_vm1, %v287_v42 }
 0x269   :  { %740 = vmatpush3.msra.mxu1 %v567_v35 }
 0x26a   :  { %741 = vmatprep.subr.mxu1 %v566_v36 }
 0x26b   :  { %742 = vmatpush3.msra.mxu1 %v566_v36 }
 0x26c   :  { %743 = vmatprep.subr.mxu1 %v565_v37 }
 0x26d   :  { %744 = vmatpush3.msra.mxu1 %v565_v37 }
 0x26e   :  { %745 = vmatprep.subr.mxu1 %v564_v38 }
 0x26f   :  { %746 = vmatpush3.msra.mxu1 %v564_v38 }
 0x328   :  { %v727_v44 = vpop.f32.mrf.mxu1 }
 0x329   :  { %v377_v45 = vadd.f32 %v727_v44, %v675_v43 }
 0x32a   :  { %v371_v46 = vpop.f32.mrf.mxu1 }
 0x32b   :  { %v372_v47 = vadd.f32 %v675_v43, %v371_v46  ;;  %v385_v48 = vsel %vm242_vm1, %v377_v45, 0.0  ;;  %v683_v46 = vld [vmem:[%s1143_s11] ss:$0 sm:$0xff] }
 0x32c   :  { %386 = vadd.xlane.f32.xlu1 %v385_v48 }
 0x32d   :  { %v382_v49 = vsel %vm242_vm1, %v372_v47, 0.0 }
 0x32e   :  { %383 = vadd.xlane.f32.xlu0 %v382_v49  ;;  %v684_v49 = vld [vmem:[%s1144_s12] ss:$0 sm:$0xff] }
 0x3b5   :  { %v387_v50 = vpop.xlane.xlu1 %386 }
 0x3b6   :  { %v389_v51 = vmul.f32 0.03125, %v387_v50 }
 0x3b7   :  { %v384_v52 = vpop.xlane.xlu0 %383 }
 0x3b8   :  { %v391_v53 = vsub.f32 %v377_v45, %v389_v51  ;;  %v388_v54 = vmul.f32 0.03125, %v384_v52 }
 0x3ba   :  { %v390_v55 = vsub.f32 %v372_v47, %v388_v54  ;;  %v393_v56 = vmul.f32 %v391_v53, %v391_v53 }
 0x3bc   :  { %v397_v57 = vsel %vm242_vm1, %v393_v56, 0.0  ;;  %v392_v58 = vmul.f32 %v390_v55, %v390_v55 }
 0x3bd   :  { %398 = vadd.xlane.f32.xlu1 %v397_v57  ;;  %v685_v57 = vld [vmem:[%s1146_s14] ss:$0 sm:$0xff] }
 0x3be   :  { %v394_v59 = vsel %vm242_vm1, %v392_v58, 0.0 }
 0x3bf   :  { %395 = vadd.xlane.f32.xlu0 %v394_v59 }
 0x446   :  { %v399_v0 = vpop.xlane.xlu1 %398 }
 0x447   :  { %v401_v1 = vmul.f32 0.03125, %v399_v0 }
 0x448   :  { %v396_v2 = vpop.xlane.xlu0 %395 }
 0x449   :  { %v403_v3 = vadd.f32 1e-05, %v401_v1  ;;  %v400_v4 = vmul.f32 0.03125, %v396_v2 }
 0x44b   :  { %764 = vrsqrt.f32 %v403_v3  ;;  %v402_v5 = vadd.f32 1e-05, %v400_v4 }
 0x44d   :  { %766 = vrsqrt.f32 %v402_v5 }
 0x458   :  { %v765_v6 = vpop.eup %764 }
 0x459   :  { %v407_v8 = vmul.f32 %v765_v6, %v391_v53 }
 0x45a   :  { %v767_v9 = vpop.eup %766 }
 0x45b   :  { %v406_v11 = vmul.f32 %v767_v9, %v390_v55  ;;  %v415_v12 = vmul.f32 %v678_v7, %v407_v8 }
 0x45d   :  { %v414_v13 = vmul.f32 %v678_v7, %v406_v11  ;;  %v423_v14 = vadd.f32 %v679_v10, %v415_v12 }
 0x45f   :  { %v422_v15 = vadd.f32 %v679_v10, %v414_v13  ;;  %v425_v17 = vmax.f32 %v423_v14, 0.0 }
 0x461   :  { %v424_v16 = vmax.f32 %v422_v15, 0.0 }
 0x463   :  { %736 = vmatprep.mubr.msk.f32.mxu0 %vm242_vm1, %v424_v16 }
 0x464   :  { %737 = vmatmul.mubr.msk.f32.vlgmr.msra.gmra.mxu0 %vm242_vm1, %v425_v17 }
 0x524   :  { %v738_v19 = vpop.f32.mrf.mxu0 }
 0x525   :  { %v515_v20 = vadd.f32 %v738_v19, %v680_v18 }
 0x526   :  { %v509_v21 = vpop.f32.mrf.mxu0 }
 0x527   :  { %v510_v22 = vadd.f32 %v680_v18, %v509_v21  ;;  %v523_v23 = vsel %vm242_vm1, %v515_v20, 0.0 }
 0x528   :  { %524 = vadd.xlane.f32.xlu1 %v523_v23 }
 0x529   :  { %v520_v24 = vsel %vm242_vm1, %v510_v22, 0.0 }
 0x52a   :  { %521 = vadd.xlane.f32.xlu0 %v520_v24 }
 0x5b1   :  { %v525_v25 = vpop.xlane.xlu1 %524 }
 0x5b2   :  { %v527_v26 = vmul.f32 0.03125, %v525_v25 }
 0x5b3   :  { %v522_v27 = vpop.xlane.xlu0 %521 }
 0x5b4   :  { %v529_v28 = vsub.f32 %v515_v20, %v527_v26  ;;  %v526_v29 = vmul.f32 0.03125, %v522_v27 }
 0x5b6   :  { %v528_v30 = vsub.f32 %v510_v22, %v526_v29  ;;  %v531_v31 = vmul.f32 %v529_v28, %v529_v28 }
 0x5b8   :  { %v535_v32 = vsel %vm242_vm1, %v531_v31, 0.0  ;;  %v530_v33 = vmul.f32 %v528_v30, %v528_v30 }
 0x5b9   :  { %536 = vadd.xlane.f32.xlu1 %v535_v32 }
 0x5ba   :  { %v532_v34 = vsel %vm242_vm1, %v530_v33, 0.0 }
 0x5bb   :  { %533 = vadd.xlane.f32.xlu0 %v532_v34 }
 0x642   :  { %v537_v39 = vpop.xlane.xlu1 %536 }
 0x643   :  { %v539_v40 = vmul.f32 0.03125, %v537_v39 }
 0x644   :  { %v534_v41 = vpop.xlane.xlu0 %533 }
 0x645   :  { %v541_v42 = vadd.f32 1e-05, %v539_v40  ;;  %v538_v43 = vmul.f32 0.03125, %v534_v41 }
 0x647   :  { %768 = vrsqrt.f32 %v541_v42  ;;  %v540_v44 = vadd.f32 1e-05, %v538_v43 }
 0x649   :  { %770 = vrsqrt.f32 %v540_v44 }
 0x654   :  { %v769_v45 = vpop.eup %768 }
 0x655   :  { %v545_v47 = vmul.f32 %v769_v45, %v529_v28 }
 0x656   :  { %v771_v48 = vpop.eup %770 }
 0x657   :  { %v544_v50 = vmul.f32 %v771_v48, %v528_v30  ;;  %v553_v51 = vmul.f32 %v683_v46, %v545_v47 }
 0x659   :  { %v552_v52 = vmul.f32 %v683_v46, %v544_v50  ;;  %v561_v53 = vadd.f32 %v684_v49, %v553_v51 }
 0x65b   :  { %v560_v54 = vadd.f32 %v684_v49, %v552_v52  ;;  %v563_v56 = vmax.f32 %v561_v53, 0.0 }
 0x65d   :  { %v562_v55 = vmax.f32 %v560_v54, 0.0 }
 0x65f   :  { %747 = vmatprep.mubr.msk.f32.mxu1 %vm242_vm1, %v562_v55 }
 0x660   :  { %748 = vmatmul.mubr.msk.f32.vlgmr.msra.gmra.mxu1 %vm242_vm1, %v563_v56 }
 0x720   :  { %v749_v58 = vpop.f32.mrf.mxu1 }
 0x721   :  { %v653_v59 = vadd.f32 %v749_v58, %v685_v57 }
 0x722   :  { %v647_v60 = vpop.f32.mrf.mxu1 }
 0x723   :  { %772 = vtanh.f32 %v653_v59  ;;  %v648_v61 = vadd.f32 %v685_v57, %v647_v60 }
 0x725   :  { %774 = vtanh.f32 %v648_v61 }
 0x730   :  { %v773_v62 = vpop.eup %772 }
 0x731   :  { %660 = vst.msk [vmem:[%s1147_s15 + $0x8] sm:$0xff] %vm658_vm2, %v773_v62 }
 0x732   :  { %v775_v63 = vpop.eup %774 }
 0x733   :  { %659 = vst.msk [vmem:[%s1147_s15] sm:$0xff] %vm658_vm2, %v775_v63 }
 0x734   :  { %665 = vsyncpa [#allocation3], 1 }
 0x735   :  { %666 = vsyncpa [#allocation5], 1 }
 0x736   :  { %667 = vsyncpa [#allocation8], 1 }
 0x737   :  { %668 = vsyncpa [#allocation11], 1 }
 0x738   :  { %669 = vsyncpa [#allocation14], 1 }

</bundles_post_ra>
